<compile_context>
chip_gen: v7x
topology: tpu7x:2x2x1
jax: 0.10.0
libtpu: 0.0.40
codegen_flags: <defaults>
</compile_context>

<pallas_src>
import jax
import jax.numpy as jnp
from jax.experimental import pallas as pl
from jax.experimental.pallas import tpu as pltpu

NEG_SLOPE = 0.01  # torch.nn.LeakyReLU default


def _leaky_relu(v):
    return jnp.where(v >= 0, v, NEG_SLOPE * v)


def refine_kernel(x_ref, w1_ref, b1_ref, w2_ref, b2_ref, w3_ref, b3_ref,
                  logsm_ref, sm_ref, acc_ref):
    k = pl.program_id(1)

    @pl.when(k == 0)
    def _():
        acc_ref[...] = jnp.zeros_like(acc_ref)

    # Running token-sum for this batch tile (f32 accumulation even for bf16 x).
    acc_ref[...] += jnp.sum(x_ref[...].astype(jnp.float32), axis=1)

    @pl.when(k == pl.num_programs(1) - 1)
    def _():
        # W1 is pre-tiled over the lane-packing factor and pre-scaled by 1/N,
        # so a single matmul on the packed sums implements mean(x, 1) @ W1.
        h1 = _leaky_relu(
            jnp.dot(acc_ref[...], w1_ref[...],
                    preferred_element_type=jnp.float32) + b1_ref[...])
        h2 = _leaky_relu(
            jnp.dot(h1, w2_ref[...],
                    preferred_element_type=jnp.float32) + b2_ref[...])
        # W3 / b3 are pre-scaled by 1/tem.
        p1 = jnp.dot(h2, w3_ref[...],
                     preferred_element_type=jnp.float32) + b3_ref[...]

        m = jnp.max(p1, axis=1, keepdims=True)
        z = p1 - m
        s = jnp.sum(jnp.exp(z), axis=1, keepdims=True)
        logsm = z - jnp.log(s)
        logsm_ref[...] = logsm
        sm_ref[...] = jnp.exp(logsm)   # exactly consistent with log_softmax


def _pick_tiles(B, NP, CP, bytes_per_elem, x_tile_budget=4 << 20):
    """Pick (TB, TN) dividing (B, NP) exactly, respecting the (8,128)/full-dim
    block constraints, with the x tile small enough that double-buffering stays
    comfortably inside every chip's scoped VMEM."""
    def divisors_desc(n):
        return [d for d in range(n, 0, -1) if n % d == 0]

    tb = B
    for d in divisors_desc(B):
        if d <= 256 and (d % 8 == 0 or d == B):
            tb = d
            break

    tn = NP
    for d in divisors_desc(NP):
        if (d % 8 == 0 or d == NP) and tb * d * CP * bytes_per_elem <= x_tile_budget:
            tn = d
            break
    return tb, tn


def refine_forward(x, params, tem=1.0):
    """x: (B, N, C). params: dict of weights stored (in_features, out_features)."""
    B, N, C = x.shape
    f32 = jnp.float32

    # --- lane packing: make the streamed last dim 128-dense when possible ---
    if C < 128 and 128 % C == 0 and N % (128 // C) == 0:
        kpack = 128 // C
    else:
        kpack = 1
    NP = N // kpack
    CP = C * kpack
    xp = x.reshape(B, NP, CP)

    # Fold 1/N into W1 and tile it kpack times along rows so the packed sums
    # map onto it directly (exact same math as mean(x,1) @ W1).
    w1 = jnp.tile(params["w1"].astype(f32), (kpack, 1)) * (1.0 / N)      # (CP, 128)
    b1 = params["b1"].reshape(1, -1).astype(f32)                          # (1, 128)

    # Pad the 30-wide hidden layer to 128 lanes (zeros are exact under leaky_relu).
    H1, H2 = params["w2"].shape                                           # (128, 30)
    H2P = 128
    w2 = jnp.zeros((H1, H2P), f32).at[:, :H2].set(params["w2"].astype(f32))
    b2 = jnp.zeros((1, H2P), f32).at[:, :H2].set(
        params["b2"].reshape(1, -1).astype(f32))

    # Fold 1/tem into the final layer (drops the SMEM scalar path entirely).
    inv_tem = 1.0 / float(tem)
    w3 = jnp.zeros((H2P, 2), f32).at[:H2, :].set(params["w3"].astype(f32)) * inv_tem
    b3 = params["b3"].reshape(1, 2).astype(f32) * inv_tem

    TB, TN = _pick_tiles(B, NP, CP, xp.dtype.itemsize)
    grid = (B // TB, NP // TN)

    x_spec = pl.BlockSpec((TB, TN, CP), lambda i, k: (i, k, 0))
    full2d = lambda a: pl.BlockSpec(a.shape, lambda i, k: (0, 0))   # resident weights
    out_spec = pl.BlockSpec((TB, 2), lambda i, k: (i, 0))           # resident over N axis

    weight_bytes = sum(a.size * a.dtype.itemsize for a in (w1, b1, w2, b2, w3, b3))
    cost = pl.CostEstimate(
        flops=2 * B * N * C + 2 * B * (CP * 128 + H1 * H2P + H2P * 2),
        transcendentals=6 * B,
        bytes_accessed=xp.size * xp.dtype.itemsize + weight_bytes + 2 * B * 2 * 4,
    )

    logsm, sm = pl.pallas_call(
        refine_kernel,
        grid=grid,
        in_specs=[x_spec, full2d(w1), full2d(b1), full2d(w2), full2d(b2),
                  full2d(w3), full2d(b3)],
        out_specs=(out_spec, out_spec),
        out_shape=(jax.ShapeDtypeStruct((B, 2), f32),
                   jax.ShapeDtypeStruct((B, 2), f32)),
        scratch_shapes=[pltpu.VMEM((TB, CP), f32)],
        compiler_params=pltpu.CompilerParams(
            dimension_semantics=("parallel", "arbitrary"),
            vmem_limit_bytes=32 * 1024 * 1024),
        cost_estimate=cost,
    )(xp, w1, b1, w2, b2, w3, b3)
    return logsm, sm


def init_params(channel, key):
    """Deterministic synthetic init matching the nn.Linear layers.
    Weights stored transposed: (in_features, out_features)."""
    ks = jax.random.split(key, 6)

    def lin(kw, kb, fan_in, fan_out):
        bound = 1.0 / float(fan_in) ** 0.5
        w = jax.random.uniform(kw, (fan_in, fan_out), jnp.float32, -bound, bound)
        b = jax.random.uniform(kb, (1, fan_out), jnp.float32, -bound, bound)
        return w, b

    w1, b1 = lin(ks[0], ks[1], channel, 128)
    w2, b2 = lin(ks[2], ks[3], 128, 30)
    w3, b3 = lin(ks[4], ks[5], 30, 2)
    return dict(w1=w1, b1=b1, w2=w2, b2=b2, w3=w3, b3=b3)


def refine_reference(x, params, tem=1.0):
    """Pure-JAX reference (uses the original, unpadded/unscaled weights)."""
    xm = jnp.mean(x, axis=1)
    h1 = _leaky_relu(xm @ params["w1"] + params["b1"])
    h2 = _leaky_relu(h1 @ params["w2"] + params["b2"])
    p1 = (h2 @ params["w3"] + params["b3"]) / tem
    return jax.nn.log_softmax(p1, axis=1), jax.nn.softmax(p1, axis=1)


# TODO(synk): nn.Dropout in training mode is not implemented (eval-mode identity here).

if __name__ == "__main__":
    B, N, C = 2, 8, 32
    key = jax.random.PRNGKey(0)
    kx, kp = jax.random.split(key)

    x = jax.random.normal(kx, (B, N, C), dtype=jnp.float32)
    params = init_params(C, kp)

    tem = 2.0
    logsm, sm = refine_forward(x, params, tem=tem)
    jax.block_until_ready((logsm, sm))

    ref_logsm, ref_sm = refine_reference(x, params, tem=tem)
    assert jnp.allclose(logsm, ref_logsm, atol=1e-5, rtol=1e-5)
    assert jnp.allclose(sm, ref_sm, atol=1e-5, rtol=1e-5)

    print("KERNEL_OK")
</pallas_src>

<mosaic_0001>
module attributes {stable_mosaic.version = 11 : i64} {
  func.func @refine_kernel(%arg0: i32, %arg1: i32, %arg2: memref<2x2x128xf32, #tpu.memory_space<vmem>>, %arg3: memref<128x128xf32, #tpu.memory_space<vmem>>, %arg4: memref<1x128xf32, #tpu.memory_space<vmem>>, %arg5: memref<128x128xf32, #tpu.memory_space<vmem>>, %arg6: memref<1x128xf32, #tpu.memory_space<vmem>>, %arg7: memref<128x2xf32, #tpu.memory_space<vmem>>, %arg8: memref<1x2xf32, #tpu.memory_space<vmem>>, %arg9: memref<2x2xf32, #tpu.memory_space<vmem>>, %arg10: memref<2x2xf32, #tpu.memory_space<vmem>>, %arg11: memref<2x128xf32, #tpu.memory_space<vmem>>) attributes {dimension_semantics = [#tpu.dimension_semantics<parallel>, #tpu.dimension_semantics<arbitrary>], iteration_bounds = array<i64: 1, 1>, scalar_prefetch = 0 : i64, scratch_operands = 1 : i64, tpu.core_type = #tpu.core_type<tc>, window_params = [{transform_indices = @transform_0, window_bounds = array<i64: 2, 2, 128>}, {pipeline_mode = #tpu.pipeline_mode<synchronous>, transform_indices = @transform_1, window_bounds = array<i64: 128, 128>}, {pipeline_mode = #tpu.pipeline_mode<synchronous>, transform_indices = @transform_2, window_bounds = array<i64: 1, 128>}, {pipeline_mode = #tpu.pipeline_mode<synchronous>, transform_indices = @transform_3, window_bounds = array<i64: 128, 128>}, {pipeline_mode = #tpu.pipeline_mode<synchronous>, transform_indices = @transform_4, window_bounds = array<i64: 1, 128>}, {pipeline_mode = #tpu.pipeline_mode<synchronous>, transform_indices = @transform_5, window_bounds = array<i64: 128, 2>}, {pipeline_mode = #tpu.pipeline_mode<synchronous>, transform_indices = @transform_6, window_bounds = array<i64: 1, 2>}, {transform_indices = @transform_7, window_bounds = array<i64: 2, 2>}, {transform_indices = @transform_8, window_bounds = array<i64: 2, 2>}]} {
    %c0_i32 = arith.constant 0 : i32
    %0 = arith.cmpi eq, %arg1, %c0_i32 : i32
    %1 = arith.extui %0 : i1 to i32
    %c0_i32_0 = arith.constant 0 : i32
    %2 = arith.cmpi ne, %1, %c0_i32_0 : i32
    scf.if %2 {
      %cst_9 = arith.constant 0.000000e+00 : f32
      %11 = vector.broadcast %cst_9 : f32 to vector<2x128xf32>
      %c0_10 = arith.constant 0 : index
      %c0_11 = arith.constant 0 : index
      %12 = vector.load %arg11[%c0_10, %c0_11] : memref<2x128xf32, #tpu.memory_space<vmem>>, vector<2x128xf32>
      tpu.vector_store %arg11[%c0_10, %c0_11], %11 {strides = array<i32>} : memref<2x128xf32, #tpu.memory_space<vmem>>, vector<2x128xf32>,
    } else {
    }
    %c0 = arith.constant 0 : index
    %c0_1 = arith.constant 0 : index
    %3 = vector.load %arg11[%c0, %c0_1] : memref<2x128xf32, #tpu.memory_space<vmem>>, vector<2x128xf32>
    %c0_2 = arith.constant 0 : index
    %c0_3 = arith.constant 0 : index
    %c0_4 = arith.constant 0 : index
    %4 = vector.load %arg2[%c0_2, %c0_3, %c0_4] : memref<2x2x128xf32, #tpu.memory_space<vmem>>, vector<2x2x128xf32>
    %cst = arith.constant dense<0.000000e+00> : vector<2x128xf32>
    %5 = vector.multi_reduction <add>, %4, %cst [1] : vector<2x2x128xf32> to vector<2x128xf32>
    %6 = arith.addf %3, %5 : vector<2x128xf32>
    %c0_5 = arith.constant 0 : index
    %c0_6 = arith.constant 0 : index
    %7 = vector.load %arg11[%c0_5, %c0_6] : memref<2x128xf32, #tpu.memory_space<vmem>>, vector<2x128xf32>
    tpu.vector_store %arg11[%c0_5, %c0_6], %6 {strides = array<i32>} : memref<2x128xf32, #tpu.memory_space<vmem>>, vector<2x128xf32>,
    %c0_i32_7 = arith.constant 0 : i32
    %8 = arith.cmpi eq, %arg1, %c0_i32_7 : i32
    %9 = arith.extui %8 : i1 to i32
    %c0_i32_8 = arith.constant 0 : i32
    %10 = arith.cmpi ne, %9, %c0_i32_8 : i32
    scf.if %10 {
      %c0_9 = arith.constant 0 : index
      %c0_10 = arith.constant 0 : index
      %11 = vector.load %arg11[%c0_9, %c0_10] : memref<2x128xf32, #tpu.memory_space<vmem>>, vector<2x128xf32>
      %c0_11 = arith.constant 0 : index
      %c0_12 = arith.constant 0 : index
      %12 = vector.load %arg3[%c0_11, %c0_12] : memref<128x128xf32, #tpu.memory_space<vmem>>, vector<128x128xf32>
      %cst_13 = arith.constant dense<0.000000e+00> : vector<2x128xf32>
      %13 = tpu.matmul %11, %12, %cst_13 {dimension_numbers = #tpu.dot_dimension_numbers<[1], [0], [0], [1], [0, 0, 1, 1], [], []>} : vector<2x128xf32>, vector<128x128xf32>, vector<2x128xf32> -> vector<2x128xf32>
      %c0_14 = arith.constant 0 : index
      %c0_15 = arith.constant 0 : index
      %14 = vector.load %arg4[%c0_14, %c0_15] : memref<1x128xf32, #tpu.memory_space<vmem>>, vector<1x128xf32>
      %15 = vector.broadcast %14 : vector<1x128xf32> to vector<2x128xf32>
      %16 = arith.addf %13, %15 : vector<2x128xf32>
      %cst_16 = arith.constant 0.000000e+00 : f32
      %17 = vector.broadcast %cst_16 : f32 to vector<2x128xf32>
      %18 = arith.cmpf oge, %16, %17 : vector<2x128xf32>
      %cst_17 = arith.constant 0.00999999977 : f32
      %19 = vector.broadcast %cst_17 : f32 to vector<2x128xf32>
      %20 = arith.mulf %19, %16 : vector<2x128xf32>
      %21 = arith.select %18, %16, %20 : vector<2x128xi1>, vector<2x128xf32>
      %c0_18 = arith.constant 0 : index
      %c0_19 = arith.constant 0 : index
      %22 = vector.load %arg5[%c0_18, %c0_19] : memref<128x128xf32, #tpu.memory_space<vmem>>, vector<128x128xf32>
      %cst_20 = arith.constant dense<0.000000e+00> : vector<2x128xf32>
      %23 = tpu.matmul %21, %22, %cst_20 {dimension_numbers = #tpu.dot_dimension_numbers<[1], [0], [0], [1], [0, 0, 1, 1], [], []>} : vector<2x128xf32>, vector<128x128xf32>, vector<2x128xf32> -> vector<2x128xf32>
      %c0_21 = arith.constant 0 : index
      %c0_22 = arith.constant 0 : index
      %24 = vector.load %arg6[%c0_21, %c0_22] : memref<1x128xf32, #tpu.memory_space<vmem>>, vector<1x128xf32>
      %25 = vector.broadcast %24 : vector<1x128xf32> to vector<2x128xf32>
      %26 = arith.addf %23, %25 : vector<2x128xf32>
      %cst_23 = arith.constant 0.000000e+00 : f32
      %27 = vector.broadcast %cst_23 : f32 to vector<2x128xf32>
      %28 = arith.cmpf oge, %26, %27 : vector<2x128xf32>
      %cst_24 = arith.constant 0.00999999977 : f32
      %29 = vector.broadcast %cst_24 : f32 to vector<2x128xf32>
      %30 = arith.mulf %29, %26 : vector<2x128xf32>
      %31 = arith.select %28, %26, %30 : vector<2x128xi1>, vector<2x128xf32>
      %c0_25 = arith.constant 0 : index
      %c0_26 = arith.constant 0 : index
      %32 = vector.load %arg7[%c0_25, %c0_26] : memref<128x2xf32, #tpu.memory_space<vmem>>, vector<128x2xf32>
      %cst_27 = arith.constant dense<0.000000e+00> : vector<2x2xf32>
      %33 = tpu.matmul %31, %32, %cst_27 {dimension_numbers = #tpu.dot_dimension_numbers<[1], [0], [0], [1], [0, 0, 1, 1], [], []>} : vector<2x128xf32>, vector<128x2xf32>, vector<2x2xf32> -> vector<2x2xf32>
      %c0_28 = arith.constant 0 : index
      %c0_29 = arith.constant 0 : index
      %34 = vector.load %arg8[%c0_28, %c0_29] : memref<1x2xf32, #tpu.memory_space<vmem>>, vector<1x2xf32>
      %35 = vector.broadcast %34 : vector<1x2xf32> to vector<2x2xf32>
      %36 = arith.addf %33, %35 : vector<2x2xf32>
      %cst_30 = arith.constant dense<0xFF800000> : vector<2xf32>
      %37 = vector.multi_reduction <maximumf>, %36, %cst_30 [1] : vector<2x2xf32> to vector<2xf32>
      %38 = vector.shape_cast %37 : vector<2xf32> to vector<2x1xf32>
      %39 = vector.broadcast %38 : vector<2x1xf32> to vector<2x2xf32>
      %40 = arith.subf %36, %39 : vector<2x2xf32>
      %41 = math.exp %40 : vector<2x2xf32>
      %cst_31 = arith.constant dense<0.000000e+00> : vector<2xf32>
      %42 = vector.multi_reduction <add>, %41, %cst_31 [1] : vector<2x2xf32> to vector<2xf32>
      %43 = vector.shape_cast %42 : vector<2xf32> to vector<2x1xf32>
      %44 = math.log %43 : vector<2x1xf32>
      %45 = vector.broadcast %44 : vector<2x1xf32> to vector<2x2xf32>
      %46 = arith.subf %40, %45 : vector<2x2xf32>
      %c0_32 = arith.constant 0 : index
      %c0_33 = arith.constant 0 : index
      %47 = vector.load %arg9[%c0_32, %c0_33] : memref<2x2xf32, #tpu.memory_space<vmem>>, vector<2x2xf32>
      tpu.vector_store %arg9[%c0_32, %c0_33], %46 {strides = array<i32>} : memref<2x2xf32, #tpu.memory_space<vmem>>, vector<2x2xf32>,
      %48 = math.exp %46 : vector<2x2xf32>
      %c0_34 = arith.constant 0 : index
      %c0_35 = arith.constant 0 : index
      %49 = vector.load %arg10[%c0_34, %c0_35] : memref<2x2xf32, #tpu.memory_space<vmem>>, vector<2x2xf32>
      tpu.vector_store %arg10[%c0_34, %c0_35], %48 {strides = array<i32>} : memref<2x2xf32, #tpu.memory_space<vmem>>, vector<2x2xf32>,
    } else {
    }
    return
  }
  func.func @transform_0(%arg0: i32, %arg1: i32) -> (i32, i32, i32) {
    %c0_i32 = arith.constant 0 : i32
    %c0_i32_0 = arith.constant 0 : i32
    return %arg0, %arg1, %c0_i32 : i32, i32, i32
  }
  func.func @transform_1(%arg0: i32, %arg1: i32) -> (i32, i32) {
    %c0_i32 = arith.constant 0 : i32
    %c0_i32_0 = arith.constant 0 : i32
    %c0_i32_1 = arith.constant 0 : i32
    return %c0_i32, %c0_i32_0 : i32, i32
  }
  func.func @transform_2(%arg0: i32, %arg1: i32) -> (i32, i32) {
    %c0_i32 = arith.constant 0 : i32
    %c0_i32_0 = arith.constant 0 : i32
    %c0_i32_1 = arith.constant 0 : i32
    return %c0_i32, %c0_i32_0 : i32, i32
  }
  func.func @transform_3(%arg0: i32, %arg1: i32) -> (i32, i32) {
    %c0_i32 = arith.constant 0 : i32
    %c0_i32_0 = arith.constant 0 : i32
    %c0_i32_1 = arith.constant 0 : i32
    return %c0_i32, %c0_i32_0 : i32, i32
  }
  func.func @transform_4(%arg0: i32, %arg1: i32) -> (i32, i32) {
    %c0_i32 = arith.constant 0 : i32
    %c0_i32_0 = arith.constant 0 : i32
    %c0_i32_1 = arith.constant 0 : i32
    return %c0_i32, %c0_i32_0 : i32, i32
  }
  func.func @transform_5(%arg0: i32, %arg1: i32) -> (i32, i32) {
    %c0_i32 = arith.constant 0 : i32
    %c0_i32_0 = arith.constant 0 : i32
    %c0_i32_1 = arith.constant 0 : i32
    return %c0_i32, %c0_i32_0 : i32, i32
  }
  func.func @transform_6(%arg0: i32, %arg1: i32) -> (i32, i32) {
    %c0_i32 = arith.constant 0 : i32
    %c0_i32_0 = arith.constant 0 : i32
    %c0_i32_1 = arith.constant 0 : i32
    return %c0_i32, %c0_i32_0 : i32, i32
  }
  func.func @transform_7(%arg0: i32, %arg1: i32) -> (i32, i32) {
    %c0_i32 = arith.constant 0 : i32
    %c0_i32_0 = arith.constant 0 : i32
    return %arg0, %c0_i32 : i32, i32
  }
  func.func @transform_8(%arg0: i32, %arg1: i32) -> (i32, i32) {
    %c0_i32 = arith.constant 0 : i32
    %c0_i32_0 = arith.constant 0 : i32
    return %arg0, %c0_i32 : i32, i32
  }
}

</mosaic_0001>

<bundles_post_ra>
// kernel: tpu_custom_call.1
= control target key start
LH: loop header
LB: loop body
LE: loop exit
PB: predicated region body
PF: predicated region fallthrough
CT: control target
= control target key end

     0   :  { %14 = vsyncpa [#allocation4], 0  ;;  %s961_s0 = inlined_call_operand.vmem [shape: f32[2,2,128], index: 0, kind: input, shape index: {}]   ;;  %s962_s1 = inlined_call_operand.vmem [shape: f32[128,128], index: 1, kind: input, shape index: {}]   ;;  %s963_s2 = inlined_call_operand.vmem [shape: f32[1,128], index: 2, kind: input, shape index: {}]   ;;  %s964_s3 = inlined_call_operand.hbm [shape: f32[128,128], index: 3, kind: input, shape index: {}]   ;;  %s965_s4 = inlined_call_operand.vmem [shape: f32[1,128], index: 4, kind: input, shape index: {}]   ;;  %s966_s5 = inlined_call_operand.vmem [shape: f32[128,2], index: 5, kind: input, shape index: {}]   ;;  %s967_s6 = inlined_call_operand.vmem [shape: f32[1,2], index: 6, kind: input, shape index: {}]   ;;  %s968_s7 = inlined_call_operand.hbm [shape: f32[2,2], index: 7, kind: output, shape index: {0}]   ;;  %s969_s8 = inlined_call_operand.hbm [shape: f32[2,2], index: 8, kind: output, shape index: {1}]  }
   0x1   :  { %15 = vsyncpa [#allocation5], 0 }
   0x2   :  { %16 = vsyncpa [#allocation8], 0  ;;  %s726_s27 = smov [#allocation3]   ;;  %s654_s9 = scalar_lea.hbm %s964_s3, 2048 }
   0x3   :  { %s28_s28 = sshll.u32 %s726_s27, 4  ;;  %p655_p0 = scmp.ne.s32.totalorder %s964_s3, %s654_s9  ;;  %s29_s28 = int_to_ptr.vmem [resolvable:$true] %s28_s28 }
   0x4   :  { %p658_p1 = scmp.lt.u32.totalorder %s654_s9, %s964_s3 }
   0x6   :  { %p660_p2 = pnand %p658_p1, %p655_p0 }
   0x8   :  { %663 = shalt.err (!%p660_p2)
}
   0x9   :  { %s664_s14 = scalar_lea.vmem %s29_s28, 2048  ;;  %p669_p4 = scmp.lt.s32.totalorder %s29_s28, %s29_s28 }
   0xa   :  { %p665_p3 = scmp.ne.s32.totalorder %s29_s28, %s664_s14  ;;  %p670_p5 = scmp.lt.s32.totalorder %s664_s14, %s664_s14 }
   0xc   :  { %p671_p6 = por %p670_p5, %p669_p4 }
   0xe   :  { %p672_p7 = pnand %p671_p6, %p665_p3 }
  0x10   :  { %675 = shalt.err (!%p672_p7)
}
  0x11   :  { %s727_s15 = smov 128   ;;  %s728_s16 = smov 8  }
  0x12   :  { %34 = dma.hbm_to_vmem [thread:$0]  %s964_s3, 2048, %s29_s28, [#allocation4], %s727_s15, %s727_s15, %s728_s16  }
  0x13   :  { %720 = dma.done.wait [#allocation4], 2048  }
  0x14   :  { %721 = vsyncadd [#allocation4], 4294965248  ;;  %v729_v0 = vmov 0.0|0.0   ;;  %v730_v1 = vmov 0.0   ;;  %vm731_vm0 = vmmov 0   ;;  %v78_v2 = vld [vmem:[%s962_s1] sm:$0xff] }
  0x15   :  { %568 = vmatprep.subr.bf16.mxu0 %v729_v0  ;;  %48 = vst [vmem:[#allocation2] sm:$0x3] %v730_v1  ;;  %592 = vmatprep.subr.bf16.mxu1 %v729_v0  ;;  %v79_v3 = vld [vmem:[%s962_s1 + $0x8] sm:$0xff]  ;;  %v80_v4 = vld [vmem:[%s962_s1 + $0x10] sm:$0xff]  ;;  %v81_v6 = vld [vmem:[%s962_s1 + $0x18] sm:$0xff]  ;;  %vm52_vm1 = vcmask 1041408  }
  0x16   :  { %495 = vmatprep.mubr.msk.f32.mxu0 %vm731_vm0, %v730_v1  ;;  %530 = vmatprep.mubr.msk.f32.mxu1 %vm731_vm0, %v730_v1  ;;  %v569_v5 = vpack.c.bf16 %v79_v3, %v78_v2  ;;  %v572_v7 = vpack.c.bf16 %v81_v6, %v80_v4  ;;  %v82_v8 = vld [vmem:[%s962_s1 + $0x20] sm:$0xff]  ;;  %v83_v9 = vld [vmem:[%s962_s1 + $0x28] sm:$0xff]  ;;  %v176_v19 = vld [vmem:[#allocation3 + $0x10] sm:$0xff]  ;;  %vm69_vm2 = vcmask 1041409   ;;  %vm363_vm5 = vcmask 9216  }
  0x17   :  { %v50_v10 = vld [vmem:[%s961_s0] sm:$0x3]  ;;  %v51_v11 = vld [vmem:[%s961_s0 + $0x2] sm:$0x3]  ;;  %v175_v14 = vld [vmem:[#allocation3 + $0x8] sm:$0xff]  ;;  %v575_v15 = vpack.c.bf16 %v83_v9, %v82_v8 }
  0x18   :  { %570 = vmatpush3.bf16.msra.mxu0 %v569_v5  ;;  %v53_v12 = vsel %vm52_vm1, %v50_v10, 0.0  ;;  %v174_v13 = vld [vmem:[#allocation3] sm:$0xff]  ;;  %v60_v17 = vsel %vm52_vm1, %v51_v11, 0.0  ;;  %v177_v20 = vld [vmem:[#allocation3 + $0x18] sm:$0xff]  ;;  %v84_v21 = vld [vmem:[%s962_s1 + $0x30] sm:$0xff] }
  0x19   :  { %571 = vmatprep.subr.bf16.mxu0 %v729_v0  ;;  %v54_v16 = vrot.slane %v53_v12, 4  ;;  %v593_v18 = vpack.c.bf16 %v175_v14, %v174_v13  ;;  %v85_v22 = vld [vmem:[%s962_s1 + $0x38] sm:$0xff]  ;;  %v61_v23 = vrot.slane %v60_v17, 4  ;;  %v596_v25 = vpack.c.bf16 %v177_v20, %v176_v19  ;;  %v178_v27 = vld [vmem:[#allocation3 + $0x20] sm:$0xff]  ;;  %v179_v28 = vld [vmem:[#allocation3 + $0x28] sm:$0xff] }
  0x1a   :  { %v578_v29 = vpack.c.bf16 %v85_v22, %v84_v21  ;;  %v86_v31 = vld [vmem:[%s962_s1 + $0x40] sm:$0xff]  ;;  %v87_v32 = vld [vmem:[%s962_s1 + $0x48] sm:$0xff]  ;;  %v599_v35 = vpack.c.bf16 %v179_v28, %v178_v27  ;;  %v180_v37 = vld [vmem:[#allocation3 + $0x30] sm:$0xff] }
  0x1b   :  { %v55_v24 = vadd.f32 %v54_v16, %v53_v12  ;;  %594 = vmatpush3.bf16.msra.mxu1 %v593_v18  ;;  %v62_v26 = vadd.f32 %v61_v23, %v60_v17  ;;  %v181_v38 = vld [vmem:[#allocation3 + $0x38] sm:$0xff]  ;;  %v581_v39 = vpack.c.bf16 %v87_v32, %v86_v31  ;;  %v88_v41 = vld [vmem:[%s962_s1 + $0x50] sm:$0xff]  ;;  %v182_v48 = vld [vmem:[#allocation3 + $0x40] sm:$0xff] }
  0x1c   :  { %573 = vmatpush3.bf16.msra.mxu0 %v572_v7  ;;  %595 = vmatprep.subr.bf16.mxu1 %v729_v0  ;;  %v89_v42 = vld [vmem:[%s962_s1 + $0x58] sm:$0xff]  ;;  %v602_v45 = vpack.c.bf16 %v181_v38, %v180_v37  ;;  %v49_v46 = vld [vmem:[#allocation2] sm:$0x3]  ;;  %v183_v49 = vld [vmem:[#allocation3 + $0x48] sm:$0xff] }
  0x1d   :  { %574 = vmatprep.subr.bf16.mxu0 %v729_v0  ;;  %v56_v30 = vrot.slane %v55_v24, 2  ;;  %v63_v33 = vrot.slane %v62_v26, 2  ;;  %v584_v50 = vpack.c.bf16 %v89_v42, %v88_v41  ;;  %v90_v51 = vld [vmem:[%s962_s1 + $0x60] sm:$0xff]  ;;  %v91_v52 = vld [vmem:[%s962_s1 + $0x68] sm:$0xff]  ;;  %v605_v55 = vpack.c.bf16 %v183_v49, %v182_v48  ;;  %v184_v56 = vld [vmem:[#allocation3 + $0x50] sm:$0xff] }
  0x1e   :  { %v185_v57 = vld [vmem:[#allocation3 + $0x58] sm:$0xff]  ;;  %v587_v58 = vpack.c.bf16 %v91_v52, %v90_v51  ;;  %v92_v59 = vld [vmem:[%s962_s1 + $0x70] sm:$0xff]  ;;  %v186_v62 = vld [vmem:[#allocation3 + $0x60] sm:$0xff] }
  0x1f   :  { %v57_v34 = vadd.f32 %v56_v30, %v55_v24  ;;  %597 = vmatpush3.bf16.msra.mxu1 %v596_v25  ;;  %v64_v36 = vadd.f32 %v63_v33, %v62_v26  ;;  %v93_v60 = vld [vmem:[%s962_s1 + $0x78] sm:$0xff]  ;;  %v608_v61 = vpack.c.bf16 %v185_v57, %v184_v56  ;;  %v187_v63 = vld [vmem:[#allocation3 + $0x68] sm:$0xff]  ;;  %v270_v8 = vld [vmem:[%s966_s5] sm:$0xff] }
  0x20   :  { %576 = vmatpush3.bf16.msra.mxu0 %v575_v15  ;;  %598 = vmatprep.subr.bf16.mxu1 %v729_v0  ;;  %v590_v2 = vpack.c.bf16 %v93_v60, %v92_v59  ;;  %v611_v3 = vpack.c.bf16 %v187_v63, %v186_v62  ;;  %v188_v5 = vld [vmem:[#allocation3 + $0x70] sm:$0xff]  ;;  %v189_v6 = vld [vmem:[#allocation3 + $0x78] sm:$0xff]  ;;  %v271_v9 = vld [vmem:[%s966_s5 + $0x8] sm:$0xff] }
  0x21   :  { %577 = vmatprep.subr.bf16.mxu0 %v729_v0  ;;  %v58_v40 = vrot.slane %v57_v34, 1  ;;  %v65_v43 = vrot.slane %v64_v36, 1  ;;  %v614_v7 = vpack.c.bf16 %v189_v6, %v188_v5  ;;  %v272_v10 = vld [vmem:[%s966_s5 + $0x10] sm:$0xff]  ;;  %v617_v11 = vpack.c.bf16 %v271_v9, %v270_v8  ;;  %v274_v13 = vld [vmem:[%s966_s5 + $0x20] sm:$0xff]  ;;  %v275_v14 = vld [vmem:[%s966_s5 + $0x28] sm:$0xff] }
  0x22   :  { %v623_v15 = vpack.c.bf16 %v275_v14, %v274_v13  ;;  %v276_v16 = vld [vmem:[%s966_s5 + $0x30] sm:$0xff]  ;;  %v277_v17 = vld [vmem:[%s966_s5 + $0x38] sm:$0xff]  ;;  %v278_v19 = vld [vmem:[%s966_s5 + $0x40] sm:$0xff] }
  0x23   :  { %v59_v44 = vadd.f32 %v58_v40, %v57_v34  ;;  %600 = vmatpush3.bf16.msra.mxu1 %v599_v35  ;;  %v66_v47 = vadd.f32 %v65_v43, %v64_v36  ;;  %v626_v18 = vpack.c.bf16 %v277_v17, %v276_v16  ;;  %v279_v20 = vld [vmem:[%s966_s5 + $0x48] sm:$0xff]  ;;  %v280_v22 = vld [vmem:[%s966_s5 + $0x50] sm:$0xff]  ;;  %v281_v23 = vld [vmem:[%s966_s5 + $0x58] sm:$0xff] }
  0x24   :  { %579 = vmatpush3.bf16.msra.mxu0 %v578_v29  ;;  %601 = vmatprep.subr.bf16.mxu1 %v729_v0  ;;  %v629_v21 = vpack.c.bf16 %v279_v20, %v278_v19  ;;  %v632_v24 = vpack.c.bf16 %v281_v23, %v280_v22  ;;  %v282_v25 = vld [vmem:[%s966_s5 + $0x60] sm:$0xff]  ;;  %v283_v26 = vld [vmem:[%s966_s5 + $0x68] sm:$0xff]  ;;  %v284_v34 = vld [vmem:[%s966_s5 + $0x70] sm:$0xff] }
  0x25   :  { %580 = vmatprep.subr.bf16.mxu0 %v729_v0  ;;  %v70_v53 = vsel %vm69_vm2, %v66_v47, %v59_v44  ;;  %v635_v27 = vpack.c.bf16 %v283_v26, %v282_v25  ;;  %v409_v28 = vld [vmem:[%s963_s2] ss:$0 sm:$0xff]  ;;  %v285_v35 = vld [vmem:[%s966_s5 + $0x78] sm:$0xff] }
  0x26   :  { %v72_v54 = vadd.f32 %v70_v53, %v49_v46  ;;  %v410_v36 = vld [vmem:[%s965_s4] ss:$0 sm:$0xff]  ;;  %s732_s4 = smov [#allocation6]  }
  0x27   :  { %603 = vmatpush3.bf16.msra.mxu1 %v602_v45  ;;  %v411_v42 = vld [vmem:[%s967_s6] ss:$0 sm:$0xff] }
  0x28   :  { %582 = vmatpush3.bf16.msra.mxu0 %v581_v39  ;;  %604 = vmatprep.subr.bf16.mxu1 %v729_v0  ;;  %73 = vst [vmem:[#allocation2] sm:$0x3] %v72_v54 }
  0x29   :  { %583 = vmatprep.subr.bf16.mxu0 %v729_v0 }
  0x2b   :  { %606 = vmatpush3.bf16.msra.mxu1 %v605_v55 }
  0x2c   :  { %585 = vmatpush3.bf16.msra.mxu0 %v584_v50  ;;  %607 = vmatprep.subr.bf16.mxu1 %v729_v0 }
  0x2d   :  { %586 = vmatprep.subr.bf16.mxu0 %v729_v0 }
  0x2f   :  { %609 = vmatpush3.bf16.msra.mxu1 %v608_v61  ;;  %v77_v4 = vld [vmem:[#allocation2] sm:$0x3] }
  0x30   :  { %588 = vmatpush3.bf16.msra.mxu0 %v587_v58  ;;  %610 = vmatprep.subr.bf16.mxu1 %v729_v0 }
  0x31   :  { %589 = vmatprep.subr.bf16.mxu0 %v729_v0 }
  0x33   :  { %612 = vmatpush3.bf16.msra.mxu1 %v611_v3 }
  0x34   :  { %591 = vmatpush3.bf16.msra.mxu0 %v590_v2  ;;  %613 = vmatprep.subr.bf16.mxu1 %v729_v0 }
  0x35   :  { %616 = vmatprep.subr.bf16.mxu0 %v729_v0 }
  0x37   :  { %496 = vmatmul.mubr.f32.vlgmr.msra.gmra.mrb[0].mxu0 %v77_v4  ;;  %615 = vmatpush3.bf16.msra.mxu1 %v614_v7 }
  0x38   :  { %565 = vmatprep.mubr.msk.f32.mxu0 %vm731_vm0, %v730_v1  ;;  %v273_v1 = vld [vmem:[%s966_s5 + $0x18] sm:$0xff]  ;;  %618 = vmatpush3.bf16.msra.mxu0 %v617_v11  ;;  %s386_s5 = sshll.u32 %s732_s4, 4  ;;  %s387_s5 = int_to_ptr.vmem [resolvable:$true] %s386_s5 }
  0x39   :  { %v620_v12 = vpack.c.bf16 %v273_v1, %v272_v10  ;;  %619 = vmatprep.subr.bf16.mxu0 %v729_v0  ;;  %s676_s6 = scalar_lea.vmem %s387_s5, 32  ;;  %p681_p9 = scmp.lt.s32.totalorder %s387_s5, %s387_s5 }
  0x3a   :  { %p677_p8 = scmp.ne.s32.totalorder %s387_s5, %s676_s6  ;;  %p682_p10 = scmp.lt.s32.totalorder %s676_s6, %s676_s6 }
  0x3c   :  { %621 = vmatpush3.bf16.msra.mxu0 %v620_v12  ;;  %p683_p11 = por %p682_p10, %p681_p9 }
  0x3d   :  { %622 = vmatprep.subr.bf16.mxu0 %v729_v0 }
  0x3e   :  { %p684_p12 = pnand %p683_p11, %p677_p8 }
  0x40   :  { %624 = vmatpush3.bf16.msra.mxu0 %v623_v15 }
  0x41   :  { %625 = vmatprep.subr.bf16.mxu0 %v729_v0 }
  0x44   :  { %627 = vmatpush3.bf16.msra.mxu0 %v626_v18 }
  0x45   :  { %628 = vmatprep.subr.bf16.mxu0 %v729_v0 }
  0x48   :  { %630 = vmatpush3.bf16.msra.mxu0 %v629_v21 }
  0x49   :  { %631 = vmatprep.subr.bf16.mxu0 %v729_v0 }
  0x4c   :  { %633 = vmatpush3.bf16.msra.mxu0 %v632_v24 }
  0x4d   :  { %634 = vmatprep.subr.bf16.mxu0 %v729_v0 }
  0x50   :  { %636 = vmatpush3.bf16.msra.mxu0 %v635_v27 }
  0x51   :  { %637 = vmatprep.subr.bf16.mxu0 %v729_v0  ;;  %v638_v0 = vpack.c.bf16 %v285_v35, %v284_v34 }
  0x54   :  { %639 = vmatpush3.bf16.msra.mxu0 %v638_v0 }
 0x10a   :  { %v167_v29 = vpop.f32.mrb[0].mxu0 }
 0x10b   :  { %v168_v30 = vadd.f32 %v409_v28, %v167_v29  ;;  %v497_v31 = vpop.f32.mrb[1].mxu0 }
 0x10d   :  { %v172_v32 = vmul.f32 0.01, %v168_v30  ;;  %vm171_vm3 = vcmp.ge.f32.partialorder %v168_v30, 0.0 }
 0x10f   :  { %v173_v33 = vsel %vm171_vm3, %v168_v30, %v172_v32 }
 0x110   :  { %531 = vmatmul.mubr.f32.vlgmr.msra.gmra.mrb[0].mxu1 %v173_v33 }
 0x1e3   :  { %v263_v37 = vpop.f32.mrb[0].mxu1 }
 0x1e4   :  { %v264_v38 = vadd.f32 %v410_v36, %v263_v37  ;;  %v532_v39 = vpop.f32.mrb[1].mxu1 }
 0x1e6   :  { %vm267_vm4 = vcmp.ge.f32.partialorder %v264_v38, 0.0  ;;  %v268_v40 = vmul.f32 0.01, %v264_v38 }
 0x1e8   :  { %v269_v41 = vsel %vm267_vm4, %v264_v38, %v268_v40 }
 0x1e9   :  { %566 = vmatmul.mubr.f32.vlgmr.msra.gmra.mrb[2].mxu0 %v269_v41 }
 0x2bc   :  { %v359_v43 = vpop.f32.mrb[2].mxu0 }
 0x2bd   :  { %v360_v44 = vadd.f32 %v411_v42, %v359_v43  ;;  %v567_v45 = vpop.f32.mrb[3].mxu0 }
 0x2bf   :  { %v364_v46 = vsel %vm363_vm5, %v360_v44, -inf }
 0x2c0   :  { %365 = vmax.xlane.f32.xlu0 %v364_v46 }
 0x34d   :  { %v366_v47 = vpop.xlane.xlu0 %365 }
 0x34e   :  { %v367_v48 = vsub.f32 %v360_v44, %v366_v47 }
 0x350   :  { %v368_v49 = vmul.f32 1.442695, %v367_v48 }
 0x352   :  { %648 = vpow2.f32 %v368_v49 }
 0x35c   :  { %v649_v50 = vpop.eup %648 }
 0x35d   :  { %v370_v51 = vsel %vm363_vm5, %v649_v50, 0.0 }
 0x35e   :  { %371 = vadd.xlane.f32.xlu0 %v370_v51 }
 0x3eb   :  { %v372_v52 = vpop.xlane.xlu0 %371 }
 0x3ec   :  { %650 = vlog2.f32 %v372_v52 }
 0x3f6   :  { %v651_v53 = vpop.eup %650 }
 0x3f7   :  { %v374_v54 = vmul.f32 0.6931472, %v651_v53 }
 0x3f9   :  { %v375_v55 = vsub.f32 %v367_v48, %v374_v54 }
 0x3fb   :  { %v377_v56 = vmul.f32 1.442695, %v375_v55  ;;  %376 = vst.msk [vmem:[#allocation6] sm:$0x3] %vm363_vm5, %v375_v55 }
 0x3fc   :  { %687 = shalt.err (!%p684_p12)
}
 0x3fd   :  { %s688_s20 = scalar_lea.hbm %s968_s7, 32 }
 0x3fe   :  { %p689_p13 = scmp.ne.s32.totalorder %s968_s7, %s688_s20  ;;  %p692_p0 = scmp.lt.u32.totalorder %s688_s20, %s968_s7 }
 0x400   :  { %p694_p1 = pnand %p692_p0, %p689_p13 }
 0x402   :  { %697 = shalt.err (!%p694_p1)
}
 0x403   :  { %389 = dma.vmem_to_hbm [thread:$0]  %s387_s5, 32, %s968_s7, [#allocation5]   ;;  %652 = vpow2.f32 %v377_v56 }
 0x404   :  { %s733_s26 = smov [#allocation7]  }
 0x405   :  { %s396_s27 = sshll.u32 %s733_s26, 4  ;;  %s397_s27 = int_to_ptr.vmem [resolvable:$true] %s396_s27 }
 0x406   :  { %s698_s28 = scalar_lea.vmem %s397_s27, 32  ;;  %p703_p3 = scmp.lt.s32.totalorder %s397_s27, %s397_s27 }
 0x407   :  { %p699_p2 = scmp.ne.s32.totalorder %s397_s27, %s698_s28  ;;  %p704_p4 = scmp.lt.s32.totalorder %s698_s28, %s698_s28 }
 0x409   :  { %p705_p5 = por %p704_p4, %p703_p3 }
 0x40b   :  { %p706_p6 = pnand %p705_p5, %p699_p2 }
 0x40d   :  { %v653_v57 = vpop.eup %652 }
 0x40e   :  { %379 = vst.msk [vmem:[#allocation7] sm:$0x3] %vm363_vm5, %v653_v57 }
 0x40f   :  { %709 = shalt.err (!%p706_p6)
}
 0x410   :  { %s710_s30 = scalar_lea.hbm %s969_s8, 32 }
 0x411   :  { %p711_p7 = scmp.ne.s32.totalorder %s969_s8, %s710_s30  ;;  %p714_p8 = scmp.lt.u32.totalorder %s710_s30, %s969_s8 }
 0x413   :  { %p716_p9 = pnand %p714_p8, %p711_p7 }
 0x415   :  { %719 = shalt.err (!%p716_p9)
}
 0x416   :  { %399 = dma.vmem_to_hbm [thread:$0]  %s397_s27, 32, %s969_s8, [#allocation8]  }
 0x417   :  { %722 = dma.done.wait [#allocation5], 32  }
 0x418   :  { %723 = vsyncadd [#allocation5], 4294967264 }
 0x419   :  { %724 = dma.done.wait [#allocation8], 32  }
 0x41a   :  { %725 = vsyncadd [#allocation8], 4294967264 }
 0x41b   :  { %406 = vsyncpa [#allocation4], 1 }
 0x41c   :  { %407 = vsyncpa [#allocation5], 1 }
 0x41d   :  { %408 = vsyncpa [#allocation8], 1 }

</bundles_post_ra>
